<compile_context>
chip_gen: v6e
topology: v6e:2x2x1
jax: 0.10.0
libtpu: 0.0.40
codegen_flags: <defaults>
</compile_context>

<pallas_src>
import numpy as np
import jax
import jax.numpy as jnp
from jax.experimental import pallas as pl
from jax.experimental.pallas import tpu as pltpu

NUM_HIDDEN_LAYERS = 3
LANE = 128  # TPU vreg lane width


def critic_kernel(inp_ref, slab_ref, wx_ref, out_ref):
    Hp = wx_ref.shape[-1]          # hidden size padded to a multiple of LANE
    tb, d_in = inp_ref.shape
    half = tb // 2

    # Static views into the single resident parameter slab.
    w_inp = slab_ref[0:d_in, :]                    # (d_in, 4*Hp)  inp-side weights
    b_all = slab_ref[d_in:d_in + 1, :]             # (1, 4*Hp)     all folded biases
    w_out = slab_ref[d_in + 1:d_in + 2, 0:Hp]      # (1, Hp)       output head row
    b_out = slab_ref[d_in + 2:d_in + 3, 0:1]       # (1, 1)        output bias

    inp = inp_ref[...]                             # (tb, d_in)

    # One lane-dense MXU push covers linear_in + the inp-half of every dense
    # hidden layer; all their biases are folded into the same add.  This sits
    # off the serial layer->layer dependency chain.
    inp_all = (jnp.dot(inp, w_inp, preferred_element_type=jnp.float32)
               + b_all)                            # (tb, 4*Hp)

    # Split into two independent batch halves to interleave the latency-bound
    # hidden-layer chains (matmul of one half overlaps relu/add of the other).
    ia0 = inp_all[0:half, :]
    ia1 = inp_all[half:tb, :]

    # linear_in + ReLU  (chunk 0 of inp_all, lane-aligned whole-vreg slice)
    x0 = jnp.maximum(ia0[:, 0:Hp], 0.0)
    x1 = jnp.maximum(ia1[:, 0:Hp], 0.0)

    # Dense hidden layers: cat([x, inp]) @ W == x @ W[:H] + inp @ W[H:]
    # (the inp-side product already sits in inp_all; chunks are 128-lane aligned).
    for i in range(NUM_HIDDEN_LAYERS):
        wx = wx_ref[i]                             # (Hp, Hp)
        lo, hi = (i + 1) * Hp, (i + 2) * Hp
        h0 = jnp.dot(x0, wx, preferred_element_type=jnp.float32) + ia0[:, lo:hi]
        h1 = jnp.dot(x1, wx, preferred_element_type=jnp.float32) + ia1[:, lo:hi]
        x0 = jnp.maximum(h0, 0.0)
        x1 = jnp.maximum(h1, 0.0)

    # Output head on the VPU/XLU (cross-lane reduce over Hp lands in the
    # otherwise-idle XLU slot) -> narrow (tile_b, 1) store, no padded lanes.
    o0 = jnp.sum(x0 * w_out, axis=-1, keepdims=True) + b_out
    o1 = jnp.sum(x1 * w_out, axis=-1, keepdims=True) + b_out
    out_ref[0:half, :] = o0
    out_ref[half:tb, :] = o1


def init_params(key, obs_size, act_size, hidden_size):
    """Deterministic init mimicking PyTorch nn.Linear default U(-1/sqrt(fan_in), +)."""
    d_in = obs_size + act_size
    d_aug = hidden_size + d_in

    def linear(k, fan_in, fan_out):
        kw, kb = jax.random.split(k)
        bound = 1.0 / np.sqrt(fan_in)
        w = jax.random.uniform(kw, (fan_in, fan_out), jnp.float32, -bound, bound)
        b = jax.random.uniform(kb, (1, fan_out), jnp.float32, -bound, bound)
        return w, b

    keys = jax.random.split(key, NUM_HIDDEN_LAYERS + 2)
    params = {}
    params["w_in"], params["b_in"] = linear(keys[0], d_in, hidden_size)
    for i in range(NUM_HIDDEN_LAYERS):
        w, b = linear(keys[1 + i], d_aug, hidden_size)
        params[f"wx{i}"] = w[:hidden_size, :]   # rows multiplying x
        params[f"wi{i}"] = w[hidden_size:, :]   # rows multiplying inp (dense conn.)
        params[f"b{i}"] = b
    params["w_out"], params["b_out"] = linear(keys[-1], hidden_size, 1)
    return params


def pack_params(params, hidden_size):
    """Host-side repack into the two lane-dense resident slabs the kernel consumes."""
    H = hidden_size
    Hp = -(-H // LANE) * LANE                      # hidden size padded to 128 lanes
    d_in = params["w_in"].shape[0]

    def pad_cols(a):                               # (r, H) -> (r, Hp), zero padded
        return jnp.pad(a, ((0, 0), (0, Hp - H)))

    # inp-consuming weights (linear_in + wi of every dense layer), each group
    # padded to a full 128-lane chunk so per-layer slices are vreg-aligned.
    w_inp = jnp.concatenate(
        [pad_cols(params["w_in"])]
        + [pad_cols(params[f"wi{i}"]) for i in range(NUM_HIDDEN_LAYERS)],
        axis=1)                                    # (d_in, 4*Hp)
    b_all = jnp.concatenate(
        [pad_cols(params["b_in"])]
        + [pad_cols(params[f"b{i}"]) for i in range(NUM_HIDDEN_LAYERS)],
        axis=1)                                    # (1, 4*Hp)

    # x-side hidden weights, zero padded to (Hp, Hp); padded lanes stay 0.
    wx = jnp.stack(
        [jnp.pad(params[f"wx{i}"], ((0, Hp - H), (0, Hp - H)))
         for i in range(NUM_HIDDEN_LAYERS)], axis=0)           # (3, Hp, Hp)

    # Output head row + bias, appended as extra rows of the same slab.
    w_out_row = jnp.zeros((1, 4 * Hp), jnp.float32).at[:, :H].set(params["w_out"].T)
    b_out_row = jnp.zeros((1, 4 * Hp), jnp.float32).at[:, :1].set(params["b_out"])

    slab = jnp.concatenate([w_inp, b_all, w_out_row, b_out_row], axis=0)
    # slab rows: [0:d_in]=w_inp, [d_in]=b_all, [d_in+1]=w_out, [d_in+2]=b_out
    return slab, wx


def critic_forward(state, action, packed, *, tile_b=None):
    slab, wx = packed
    # glue: PyTorch's torch.cat([state, action], 1)
    inp = jnp.concatenate([state, action], axis=1).astype(jnp.float32)
    B, d_in = inp.shape

    # Batch tile: multiple of 16 (two interleaved halves of >= 8 sublanes each),
    # sized so the grid has >= 2 steps when B > 16 (v7x megacore / DMA double
    # buffering), capped at 1024 to amortize per-grid-step overhead.
    if tile_b is None:
        if B <= 16:
            tile_b = 16
        else:
            target = -(-B // 2)
            tile_b = min(1024, max(16, (target // 16) * 16))
    tile_b = max(16, (tile_b // 16) * 16)

    B_pad = -(-B // tile_b) * tile_b
    if B_pad != B:
        inp = jnp.pad(inp, ((0, B_pad - B), (0, 0)))
    grid = (B_pad // tile_b,)

    def resident(shape):
        # full-array block, same block for every grid step -> stays in VMEM
        return pl.BlockSpec(shape, lambda i: tuple(0 for _ in shape))

    out = pl.pallas_call(
        critic_kernel,
        out_shape=jax.ShapeDtypeStruct((B_pad, 1), jnp.float32),
        grid=grid,
        in_specs=[
            pl.BlockSpec((tile_b, d_in), lambda i: (i, 0)),   # batched activation
            resident(slab.shape),                             # all inp-side params
            resident(wx.shape),                               # x-side hidden weights
        ],
        out_specs=pl.BlockSpec((tile_b, 1), lambda i: (i, 0)),
        compiler_params=pltpu.CompilerParams(
            dimension_semantics=("parallel",)),
    )(inp, slab, wx)

    return out[:B, :]


def critic_ref(state, action, params):
    """Pure-JAX reference mirroring the PyTorch module exactly."""
    inp = jnp.concatenate([state, action], axis=1)
    x = jax.nn.relu(inp @ params["w_in"] + params["b_in"])
    for i in range(NUM_HIDDEN_LAYERS):
        x = jax.nn.relu(x @ params[f"wx{i}"] + inp @ params[f"wi{i}"] + params[f"b{i}"])
    return x @ params["w_out"] + params["b_out"]


if __name__ == "__main__":
    B, OBS, ACT, HID = 8, 12, 4, 32

    key = jax.random.PRNGKey(0)
    k_state, k_action, k_params = jax.random.split(key, 3)
    state = jax.random.normal(k_state, (B, OBS), dtype=jnp.float32)
    action = jax.random.normal(k_action, (B, ACT), dtype=jnp.float32)
    params = init_params(k_params, OBS, ACT, HID)
    packed = pack_params(params, HID)

    out = jax.block_until_ready(critic_forward(state, action, packed))
    ref = jax.block_until_ready(critic_ref(state, action, params))
    np.testing.assert_allclose(np.asarray(out), np.asarray(ref), rtol=1e-3, atol=1e-3)

    print("KERNEL_OK")
</pallas_src>

<mosaic_0001>
module attributes {stable_mosaic.version = 11 : i64} {
  func.func @critic_kernel(%arg0: i32, %arg1: memref<16x16xf32, #tpu.memory_space<vmem>>, %arg2: memref<19x512xf32, #tpu.memory_space<vmem>>, %arg3: memref<3x128x128xf32, #tpu.memory_space<vmem>>, %arg4: memref<16x1xf32, #tpu.memory_space<vmem>>) attributes {dimension_semantics = [#tpu.dimension_semantics<parallel>], iteration_bounds = array<i64: 1>, scalar_prefetch = 0 : i64, scratch_operands = 0 : i64, tpu.core_type = #tpu.core_type<tc>, window_params = [{transform_indices = @transform_0, window_bounds = array<i64: 16, 16>}, {pipeline_mode = #tpu.pipeline_mode<synchronous>, transform_indices = @transform_1, window_bounds = array<i64: 19, 512>}, {pipeline_mode = #tpu.pipeline_mode<synchronous>, transform_indices = @transform_2, window_bounds = array<i64: 3, 128, 128>}, {transform_indices = @transform_3, window_bounds = array<i64: 16, 1>}]} {
    %c0 = arith.constant 0 : index
    %c0_0 = arith.constant 0 : index
    %0 = vector.load %arg2[%c0, %c0_0] : memref<19x512xf32, #tpu.memory_space<vmem>>, vector<16x512xf32>
    %c16 = arith.constant 16 : index
    %c0_1 = arith.constant 0 : index
    %1 = vector.load %arg2[%c16, %c0_1] : memref<19x512xf32, #tpu.memory_space<vmem>>, vector<1x512xf32>
    %c17 = arith.constant 17 : index
    %c0_2 = arith.constant 0 : index
    %2 = vector.load %arg2[%c17, %c0_2] : memref<19x512xf32, #tpu.memory_space<vmem>>, vector<1x128xf32>
    %c18 = arith.constant 18 : index
    %c0_3 = arith.constant 0 : index
    %3 = vector.load %arg2[%c18, %c0_3] : memref<19x512xf32, #tpu.memory_space<vmem>>, vector<1x1xf32>
    %c0_4 = arith.constant 0 : index
    %c0_5 = arith.constant 0 : index
    %4 = vector.load %arg1[%c0_4, %c0_5] : memref<16x16xf32, #tpu.memory_space<vmem>>, vector<16x16xf32>
    %cst = arith.constant dense<0.000000e+00> : vector<16x512xf32>
    %5 = tpu.matmul %4, %0, %cst {dimension_numbers = #tpu.dot_dimension_numbers<[1], [0], [0], [1], [0, 0, 1, 1], [], []>} : vector<16x16xf32>, vector<16x512xf32>, vector<16x512xf32> -> vector<16x512xf32>
    %6 = vector.broadcast %1 : vector<1x512xf32> to vector<16x512xf32>
    %7 = arith.addf %5, %6 : vector<16x512xf32>
    %8 = vector.extract_strided_slice %7 {offsets = [0, 0], sizes = [8, 512], strides = [1, 1]} : vector<16x512xf32> to vector<8x512xf32>
    %9 = vector.extract_strided_slice %7 {offsets = [8, 0], sizes = [8, 512], strides = [1, 1]} : vector<16x512xf32> to vector<8x512xf32>
    %10 = vector.extract_strided_slice %8 {offsets = [0, 0], sizes = [8, 128], strides = [1, 1]} : vector<8x512xf32> to vector<8x128xf32>
    %cst_6 = arith.constant 0.000000e+00 : f32
    %11 = vector.broadcast %cst_6 : f32 to vector<8x128xf32>
    %12 = arith.maximumf %10, %11 : vector<8x128xf32>
    %13 = vector.extract_strided_slice %9 {offsets = [0, 0], sizes = [8, 128], strides = [1, 1]} : vector<8x512xf32> to vector<8x128xf32>
    %cst_7 = arith.constant 0.000000e+00 : f32
    %14 = vector.broadcast %cst_7 : f32 to vector<8x128xf32>
    %15 = arith.maximumf %13, %14 : vector<8x128xf32>
    %c0_8 = arith.constant 0 : index
    %c0_9 = arith.constant 0 : index
    %c0_10 = arith.constant 0 : index
    %16 = vector.load %arg3[%c0_8, %c0_9, %c0_10] : memref<3x128x128xf32, #tpu.memory_space<vmem>>, vector<1x128x128xf32>
    %17 = vector.shape_cast %16 : vector<1x128x128xf32> to vector<128x128xf32>
    %cst_11 = arith.constant dense<0.000000e+00> : vector<8x128xf32>
    %18 = tpu.matmul %12, %17, %cst_11 {dimension_numbers = #tpu.dot_dimension_numbers<[1], [0], [0], [1], [0, 0, 1, 1], [], []>} : vector<8x128xf32>, vector<128x128xf32>, vector<8x128xf32> -> vector<8x128xf32>
    %19 = vector.extract_strided_slice %8 {offsets = [0, 128], sizes = [8, 128], strides = [1, 1]} : vector<8x512xf32> to vector<8x128xf32>
    %20 = arith.addf %18, %19 : vector<8x128xf32>
    %cst_12 = arith.constant dense<0.000000e+00> : vector<8x128xf32>
    %21 = tpu.matmul %15, %17, %cst_12 {dimension_numbers = #tpu.dot_dimension_numbers<[1], [0], [0], [1], [0, 0, 1, 1], [], []>} : vector<8x128xf32>, vector<128x128xf32>, vector<8x128xf32> -> vector<8x128xf32>
    %22 = vector.extract_strided_slice %9 {offsets = [0, 128], sizes = [8, 128], strides = [1, 1]} : vector<8x512xf32> to vector<8x128xf32>
    %23 = arith.addf %21, %22 : vector<8x128xf32>
    %cst_13 = arith.constant 0.000000e+00 : f32
    %24 = vector.broadcast %cst_13 : f32 to vector<8x128xf32>
    %25 = arith.maximumf %20, %24 : vector<8x128xf32>
    %cst_14 = arith.constant 0.000000e+00 : f32
    %26 = vector.broadcast %cst_14 : f32 to vector<8x128xf32>
    %27 = arith.maximumf %23, %26 : vector<8x128xf32>
    %c1 = arith.constant 1 : index
    %c0_15 = arith.constant 0 : index
    %c0_16 = arith.constant 0 : index
    %28 = vector.load %arg3[%c1, %c0_15, %c0_16] : memref<3x128x128xf32, #tpu.memory_space<vmem>>, vector<1x128x128xf32>
    %29 = vector.shape_cast %28 : vector<1x128x128xf32> to vector<128x128xf32>
    %cst_17 = arith.constant dense<0.000000e+00> : vector<8x128xf32>
    %30 = tpu.matmul %25, %29, %cst_17 {dimension_numbers = #tpu.dot_dimension_numbers<[1], [0], [0], [1], [0, 0, 1, 1], [], []>} : vector<8x128xf32>, vector<128x128xf32>, vector<8x128xf32> -> vector<8x128xf32>
    %31 = vector.extract_strided_slice %8 {offsets = [0, 256], sizes = [8, 128], strides = [1, 1]} : vector<8x512xf32> to vector<8x128xf32>
    %32 = arith.addf %30, %31 : vector<8x128xf32>
    %cst_18 = arith.constant dense<0.000000e+00> : vector<8x128xf32>
    %33 = tpu.matmul %27, %29, %cst_18 {dimension_numbers = #tpu.dot_dimension_numbers<[1], [0], [0], [1], [0, 0, 1, 1], [], []>} : vector<8x128xf32>, vector<128x128xf32>, vector<8x128xf32> -> vector<8x128xf32>
    %34 = vector.extract_strided_slice %9 {offsets = [0, 256], sizes = [8, 128], strides = [1, 1]} : vector<8x512xf32> to vector<8x128xf32>
    %35 = arith.addf %33, %34 : vector<8x128xf32>
    %cst_19 = arith.constant 0.000000e+00 : f32
    %36 = vector.broadcast %cst_19 : f32 to vector<8x128xf32>
    %37 = arith.maximumf %32, %36 : vector<8x128xf32>
    %cst_20 = arith.constant 0.000000e+00 : f32
    %38 = vector.broadcast %cst_20 : f32 to vector<8x128xf32>
    %39 = arith.maximumf %35, %38 : vector<8x128xf32>
    %c2 = arith.constant 2 : index
    %c0_21 = arith.constant 0 : index
    %c0_22 = arith.constant 0 : index
    %40 = vector.load %arg3[%c2, %c0_21, %c0_22] : memref<3x128x128xf32, #tpu.memory_space<vmem>>, vector<1x128x128xf32>
    %41 = vector.shape_cast %40 : vector<1x128x128xf32> to vector<128x128xf32>
    %cst_23 = arith.constant dense<0.000000e+00> : vector<8x128xf32>
    %42 = tpu.matmul %37, %41, %cst_23 {dimension_numbers = #tpu.dot_dimension_numbers<[1], [0], [0], [1], [0, 0, 1, 1], [], []>} : vector<8x128xf32>, vector<128x128xf32>, vector<8x128xf32> -> vector<8x128xf32>
    %43 = vector.extract_strided_slice %8 {offsets = [0, 384], sizes = [8, 128], strides = [1, 1]} : vector<8x512xf32> to vector<8x128xf32>
    %44 = arith.addf %42, %43 : vector<8x128xf32>
    %cst_24 = arith.constant dense<0.000000e+00> : vector<8x128xf32>
    %45 = tpu.matmul %39, %41, %cst_24 {dimension_numbers = #tpu.dot_dimension_numbers<[1], [0], [0], [1], [0, 0, 1, 1], [], []>} : vector<8x128xf32>, vector<128x128xf32>, vector<8x128xf32> -> vector<8x128xf32>
    %46 = vector.extract_strided_slice %9 {offsets = [0, 384], sizes = [8, 128], strides = [1, 1]} : vector<8x512xf32> to vector<8x128xf32>
    %47 = arith.addf %45, %46 : vector<8x128xf32>
    %cst_25 = arith.constant 0.000000e+00 : f32
    %48 = vector.broadcast %cst_25 : f32 to vector<8x128xf32>
    %49 = arith.maximumf %44, %48 : vector<8x128xf32>
    %cst_26 = arith.constant 0.000000e+00 : f32
    %50 = vector.broadcast %cst_26 : f32 to vector<8x128xf32>
    %51 = arith.maximumf %47, %50 : vector<8x128xf32>
    %52 = vector.broadcast %2 : vector<1x128xf32> to vector<8x128xf32>
    %53 = arith.mulf %49, %52 : vector<8x128xf32>
    %cst_27 = arith.constant dense<0.000000e+00> : vector<8xf32>
    %54 = vector.multi_reduction <add>, %53, %cst_27 [1] : vector<8x128xf32> to vector<8xf32>
    %55 = vector.shape_cast %54 : vector<8xf32> to vector<8x1xf32>
    %56 = vector.broadcast %3 : vector<1x1xf32> to vector<8x1xf32>
    %57 = arith.addf %55, %56 : vector<8x1xf32>
    %58 = vector.broadcast %2 : vector<1x128xf32> to vector<8x128xf32>
    %59 = arith.mulf %51, %58 : vector<8x128xf32>
    %cst_28 = arith.constant dense<0.000000e+00> : vector<8xf32>
    %60 = vector.multi_reduction <add>, %59, %cst_28 [1] : vector<8x128xf32> to vector<8xf32>
    %61 = vector.shape_cast %60 : vector<8xf32> to vector<8x1xf32>
    %62 = vector.broadcast %3 : vector<1x1xf32> to vector<8x1xf32>
    %63 = arith.addf %61, %62 : vector<8x1xf32>
    %c0_29 = arith.constant 0 : index
    %c0_30 = arith.constant 0 : index
    %64 = vector.load %arg4[%c0_29, %c0_30] : memref<16x1xf32, #tpu.memory_space<vmem>>, vector<8x1xf32>
    tpu.vector_store %arg4[%c0_29, %c0_30], %57 {strides = array<i32>} : memref<16x1xf32, #tpu.memory_space<vmem>>, vector<8x1xf32>,
    %c8 = arith.constant 8 : index
    %c0_31 = arith.constant 0 : index
    %65 = vector.load %arg4[%c8, %c0_31] : memref<16x1xf32, #tpu.memory_space<vmem>>, vector<8x1xf32>
    tpu.vector_store %arg4[%c8, %c0_31], %63 {strides = array<i32>} : memref<16x1xf32, #tpu.memory_space<vmem>>, vector<8x1xf32>,
    return
  }
  func.func @transform_0(%arg0: i32) -> (i32, i32) {
    %c0_i32 = arith.constant 0 : i32
    %c0_i32_0 = arith.constant 0 : i32
    return %arg0, %c0_i32 : i32, i32
  }
  func.func @transform_1(%arg0: i32) -> (i32, i32) {
    %c0_i32 = arith.constant 0 : i32
    %c0_i32_0 = arith.constant 0 : i32
    %c0_i32_1 = arith.constant 0 : i32
    return %c0_i32, %c0_i32_0 : i32, i32
  }
  func.func @transform_2(%arg0: i32) -> (i32, i32, i32) {
    %c0_i32 = arith.constant 0 : i32
    %c0_i32_0 = arith.constant 0 : i32
    %c0_i32_1 = arith.constant 0 : i32
    %c0_i32_2 = arith.constant 0 : i32
    return %c0_i32, %c0_i32_0, %c0_i32_1 : i32, i32, i32
  }
  func.func @transform_3(%arg0: i32) -> (i32, i32) {
    %c0_i32 = arith.constant 0 : i32
    %c0_i32_0 = arith.constant 0 : i32
    return %arg0, %c0_i32 : i32, i32
  }
}

</mosaic_0001>

<bundles_post_ra>
// kernel: tpu_custom_call.1
= control target key start
LH: loop header
LB: loop body
LE: loop exit
PB: predicated region body
PF: predicated region fallthrough
CT: control target
= control target key end

     0   :  { %8 = vsyncpa [#allocation3], 0  ;;  %s1326_s0 = inlined_call_operand.hbm [shape: f32[16,16], index: 0, kind: input, shape index: {}]   ;;  %s1327_s1 = inlined_call_operand.hbm [shape: f32[19,512], index: 1, kind: input, shape index: {}]   ;;  %s1328_s2 = inlined_call_operand.hbm [shape: f32[3,128,128], index: 2, kind: input, shape index: {}]   ;;  %s1329_s3 = inlined_call_operand.vmem [shape: f32[16,1], index: 3, kind: output, shape index: {}]  }
   0x1   :  { %9 = vsyncpa [#allocation5], 0  ;;  %s1135_s12 = smov [#allocation4]  }
   0x2   :  { %s27_s13 = sshll.u32 %s1135_s12, 4  ;;  %s28_s13 = int_to_ptr.vmem [resolvable:$true] %s27_s13 }
   0x3   :  { %s1079_s14 = scalar_lea.vmem %s28_s13, 1536  ;;  %p1084_p1 = scmp.lt.s32.totalorder %s28_s13, %s28_s13 }
   0x4   :  { %p1080_p0 = scmp.ne.s32.totalorder %s28_s13, %s1079_s14  ;;  %p1085_p2 = scmp.lt.s32.totalorder %s1079_s14, %s1079_s14 }
   0x6   :  { %p1086_p3 = por %p1085_p2, %p1084_p1 }
   0x8   :  { %p1087_p4 = pnand %p1086_p3, %p1080_p0 }
   0xa   :  { %1090 = shalt.err (!%p1087_p4)
}
   0xb   :  { %s1136_s15 = smov 512   ;;  %s1137_s16 = smov 32  }
   0xc   :  { %33 = dma.hbm_to_vmem [thread:$0]  %s1327_s1, 1536, %s28_s13, [#allocation5], %s1136_s15, %s1136_s15, %s1137_s16  }
   0xd   :  { %s1138_s19 = smov [#allocation2]  }
   0xe   :  { %s15_s20 = sshll.u32 %s1138_s19, 4  ;;  %s16_s20 = int_to_ptr.vmem [resolvable:$true] %s15_s20 }
   0xf   :  { %s1099_s21 = scalar_lea.vmem %s16_s20, 256  ;;  %p1104_p6 = scmp.lt.s32.totalorder %s16_s20, %s16_s20 }
  0x10   :  { %p1100_p5 = scmp.ne.s32.totalorder %s16_s20, %s1099_s21  ;;  %p1105_p7 = scmp.lt.s32.totalorder %s1099_s21, %s1099_s21 }
  0x12   :  { %p1106_p8 = por %p1105_p7, %p1104_p6 }
  0x14   :  { %p1107_p9 = pnand %p1106_p8, %p1100_p5 }
  0x16   :  { %1110 = shalt.err (!%p1107_p9)
}
  0x17   :  { %s1139_s22 = smov 128   ;;  %s1140_s23 = smov 8  }
  0x18   :  { %21 = dma.hbm_to_vmem [thread:$0]  %s1326_s0, 256, %s16_s20, [#allocation3], %s1139_s22, %s1139_s22, %s1140_s23  }
  0x19   :  { %s1141_s26 = smov [#allocation6]  }
  0x1a   :  { %s39_s27 = sshll.u32 %s1141_s26, 4  ;;  %s40_s27 = int_to_ptr.vmem [resolvable:$true] %s39_s27 }
  0x1b   :  { %s1119_s1 = scalar_lea.vmem %s40_s27, 6144  ;;  %p1124_p11 = scmp.lt.s32.totalorder %s40_s27, %s40_s27 }
  0x1c   :  { %p1120_p10 = scmp.ne.s32.totalorder %s40_s27, %s1119_s1  ;;  %p1125_p12 = scmp.lt.s32.totalorder %s1119_s1, %s1119_s1 }
  0x1e   :  { %p1126_p13 = por %p1125_p12, %p1124_p11 }
  0x20   :  { %p1127_p0 = pnand %p1126_p13, %p1120_p10 }
  0x22   :  { %1130 = shalt.err (!%p1127_p0)
}
  0x23   :  { %45 = dma.hbm_to_vmem [thread:$0]  %s1328_s2, 6144, %s40_s27, [#allocation5], %s1139_s22, %s1139_s22, %s1140_s23  }
  0x24   :  { %1131 = dma.done.wait [#allocation3], 256  }
  0x25   :  { %1132 = vsyncadd [#allocation3], 4294967040 }
  0x26   :  { %1133 = dma.done.wait [#allocation5], 7680  }
  0x27   :  { %1134 = vsyncadd [#allocation5], 4294959616  ;;  %v1142_v0 = vmov 0.0   ;;  %v60_v1 = vld [vmem:[#allocation4 + $0x28] sm:$0xff]  ;;  %v59_v2 = vld [vmem:[#allocation4 + $0x20] sm:$0xff]  ;;  %vm90_vm0 = vcmask 130048   ;;  %v70_v27 = vlaneseq }
  0x28   :  { %161 = vmatprep.mubr.f32.mxu0 %v1142_v0  ;;  %238 = vmatprep.mubr.f32.mxu1 %v1142_v0  ;;  %v56_v3 = vld [vmem:[#allocation4 + $0x8] sm:$0xff]  ;;  %v55_v4 = vld [vmem:[#allocation4] sm:$0xff]  ;;  %v67_v5 = vld [vmem:[#allocation2] sm:$0xff]  ;;  %vm1143_vm1 = vmmov 0   ;;  %vm737_vm2 = vcmask 7168  }
  0x29   :  { %125 = vmatprep.subr.mxu0 %v60_v1  ;;  %v62_v6 = vld [vmem:[#allocation4 + $0x38] sm:$0xff]  ;;  %v61_v7 = vld [vmem:[#allocation4 + $0x30] sm:$0xff]  ;;  %v266_v13 = vld [vmem:[#allocation6 + $0x68] sm:$0xff]  ;;  %v1223_v28 = vshrl.u32 %v70_v27, 7 }
  0x2a   :  { %126 = vmatpush1.msra.mxu0 %v59_v2  ;;  %202 = vmatprep.subr.mxu1 %v62_v6  ;;  %v58_v8 = vld [vmem:[#allocation4 + $0x18] sm:$0xff]  ;;  %v57_v10 = vld [vmem:[#allocation4 + $0x10] sm:$0xff]  ;;  %v265_v14 = vld [vmem:[#allocation6 + $0x60] sm:$0xff] }
  0x2b   :  { %127 = vmatprep.subr.mxu0 %v56_v3  ;;  %203 = vmatpush1.msra.mxu1 %v61_v7  ;;  %v268_v9 = vld [vmem:[#allocation6 + $0x78] sm:$0xff]  ;;  %v267_v12 = vld [vmem:[#allocation6 + $0x70] sm:$0xff]  ;;  %v262_v17 = vld [vmem:[#allocation6 + $0x48] sm:$0xff]  ;;  %v72_v29 = vsub.s32 0, %v1223_v28  ;;  %v76_v55 = vsub.s32 1, %v1223_v28 }
  0x2c   :  { %128 = vmatpush1.msra.mxu0 %v55_v4  ;;  %v1178_v11 = vld [vmem:[#allocation2 + $0x8] sm:$0xff]  ;;  %204 = vmatprep.subr.mxu1 %v58_v8  ;;  %v263_v16 = vld [vmem:[#allocation6 + $0x50] sm:$0xff]  ;;  %v261_v18 = vld [vmem:[#allocation6 + $0x40] sm:$0xff] }
  0x2d   :  { %746 = vmatmul.mubr.msk.f32.vlgmr.msra.gmra.mxu0 %vm90_vm0, %v67_v5  ;;  %852 = vmatprep.subr.mxu0 %v1142_v0  ;;  %v264_v15 = vld [vmem:[#allocation6 + $0x58] sm:$0xff]  ;;  %v259_v20 = vld [vmem:[#allocation6 + $0x30] sm:$0xff]  ;;  %v258_v21 = vld [vmem:[#allocation6 + $0x28] sm:$0xff] }
  0x2e   :  { %167 = vmatprep.mubr.f32.mxu0 %v1142_v0  ;;  %853 = vmatpush3.msra.mxu0 %v268_v9  ;;  %v260_v19 = vld [vmem:[#allocation6 + $0x38] sm:$0xff]  ;;  %v257_v22 = vld [vmem:[#allocation6 + $0x20] sm:$0xff]  ;;  %v255_v24 = vld [vmem:[#allocation6 + $0x10] sm:$0xff] }
  0x2f   :  { %205 = vmatpush1.msra.mxu1 %v57_v10  ;;  %854 = vmatprep.subr.mxu0 %v1142_v0  ;;  %v256_v23 = vld [vmem:[#allocation6 + $0x18] sm:$0xff]  ;;  %v254_v25 = vld [vmem:[#allocation6 + $0x8] sm:$0xff]  ;;  %v253_v26 = vld [vmem:[#allocation6] sm:$0xff] }
  0x30   :  { %748 = vmatmul.mubr.msk.f32.vlgmr.msra.gmra.mxu1 %vm90_vm0, %v67_v5  ;;  %887 = vmatprep.subr.mxu1 %v1142_v0  ;;  %v1226_v30 = vld [vmem:[#allocation4 + $0x40] ss:$8 sm:$0xf] }
  0x31   :  { %747 = vmatmul.mubr.msk.f32.gmra.mxu0 %vm90_vm0, %v1178_v11  ;;  %888 = vmatpush3.msra.mxu1 %v268_v9  ;;  %v73_v31 = vrot.slane %v1226_v30, %v72_v29  ;;  %v427_v36 = vld [vmem:[#allocation6 + $0xf8] sm:$0xff]  ;;  %v426_v39 = vld [vmem:[#allocation6 + $0xf0] sm:$0xff]  ;;  %v425_v41 = vld [vmem:[#allocation6 + $0xe8] sm:$0xff]  ;;  %v77_v57 = vrot.slane %v1226_v30, %v76_v55 }
  0x32   :  { %855 = vmatpush3.msra.mxu0 %v267_v12  ;;  %889 = vmatprep.subr.mxu1 %v1142_v0  ;;  %v424_v42 = vld [vmem:[#allocation6 + $0xe0] sm:$0xff]  ;;  %v423_v43 = vld [vmem:[#allocation6 + $0xd8] sm:$0xff]  ;;  %v422_v44 = vld [vmem:[#allocation6 + $0xd0] sm:$0xff] }
  0x33   :  { %856 = vmatprep.subr.mxu0 %v1142_v0  ;;  %890 = vmatpush3.msra.mxu1 %v267_v12  ;;  %v421_v45 = vld [vmem:[#allocation6 + $0xc8] sm:$0xff]  ;;  %v420_v46 = vld [vmem:[#allocation6 + $0xc0] sm:$0xff]  ;;  %v419_v47 = vld [vmem:[#allocation6 + $0xb8] sm:$0xff] }
  0x34   :  { %857 = vmatpush3.msra.mxu0 %v266_v13  ;;  %891 = vmatprep.subr.mxu1 %v1142_v0  ;;  %v418_v48 = vld [vmem:[#allocation6 + $0xb0] sm:$0xff]  ;;  %v417_v49 = vld [vmem:[#allocation6 + $0xa8] sm:$0xff]  ;;  %v416_v50 = vld [vmem:[#allocation6 + $0xa0] sm:$0xff] }
  0x35   :  { %858 = vmatprep.subr.mxu0 %v1142_v0  ;;  %892 = vmatpush3.msra.mxu1 %v266_v13  ;;  %v415_v51 = vld [vmem:[#allocation6 + $0x98] sm:$0xff]  ;;  %v414_v52 = vld [vmem:[#allocation6 + $0x90] sm:$0xff]  ;;  %v413_v53 = vld [vmem:[#allocation6 + $0x88] sm:$0xff] }
  0x36   :  { %859 = vmatpush3.msra.mxu0 %v265_v14  ;;  %893 = vmatprep.subr.mxu1 %v1142_v0  ;;  %v412_v54 = vld [vmem:[#allocation6 + $0x80] sm:$0xff]  ;;  %v586_v5 = vld [vmem:[#allocation6 + $0x178] sm:$0xff]  ;;  %v585_v8 = vld [vmem:[#allocation6 + $0x170] sm:$0xff] }
  0x37   :  { %860 = vmatprep.subr.mxu0 %v1142_v0  ;;  %894 = vmatpush3.msra.mxu1 %v265_v14  ;;  %v583_v12 = vld [vmem:[#allocation6 + $0x160] sm:$0xff]  ;;  %v582_v13 = vld [vmem:[#allocation6 + $0x158] sm:$0xff]  ;;  %v581_v14 = vld [vmem:[#allocation6 + $0x150] sm:$0xff] }
  0x38   :  { %861 = vmatpush3.msra.mxu0 %v264_v15  ;;  %895 = vmatprep.subr.mxu1 %v1142_v0 }
  0x39   :  { %862 = vmatprep.subr.mxu0 %v1142_v0  ;;  %896 = vmatpush3.msra.mxu1 %v264_v15  ;;  %v580_v15 = vld [vmem:[#allocation6 + $0x148] sm:$0xff] }
  0x3a   :  { %863 = vmatpush3.msra.mxu0 %v263_v16  ;;  %897 = vmatprep.subr.mxu1 %v1142_v0 }
  0x3b   :  { %864 = vmatprep.subr.mxu0 %v1142_v0  ;;  %898 = vmatpush3.msra.mxu1 %v263_v16  ;;  %v579_v16 = vld [vmem:[#allocation6 + $0x140] sm:$0xff] }
  0x3c   :  { %865 = vmatpush3.msra.mxu0 %v262_v17  ;;  %899 = vmatprep.subr.mxu1 %v1142_v0 }
  0x3d   :  { %866 = vmatprep.subr.mxu0 %v1142_v0  ;;  %900 = vmatpush3.msra.mxu1 %v262_v17  ;;  %v578_v17 = vld [vmem:[#allocation6 + $0x138] sm:$0xff] }
  0x3e   :  { %867 = vmatpush3.msra.mxu0 %v261_v18  ;;  %901 = vmatprep.subr.mxu1 %v1142_v0 }
  0x3f   :  { %868 = vmatprep.subr.mxu0 %v1142_v0  ;;  %902 = vmatpush3.msra.mxu1 %v261_v18  ;;  %v577_v18 = vld [vmem:[#allocation6 + $0x130] sm:$0xff] }
  0x40   :  { %869 = vmatpush3.msra.mxu0 %v260_v19  ;;  %903 = vmatprep.subr.mxu1 %v1142_v0 }
  0x41   :  { %870 = vmatprep.subr.mxu0 %v1142_v0  ;;  %904 = vmatpush3.msra.mxu1 %v260_v19  ;;  %v576_v19 = vld [vmem:[#allocation6 + $0x128] sm:$0xff] }
  0x42   :  { %871 = vmatpush3.msra.mxu0 %v259_v20  ;;  %905 = vmatprep.subr.mxu1 %v1142_v0 }
  0x43   :  { %872 = vmatprep.subr.mxu0 %v1142_v0  ;;  %906 = vmatpush3.msra.mxu1 %v259_v20  ;;  %v575_v20 = vld [vmem:[#allocation6 + $0x120] sm:$0xff] }
  0x44   :  { %873 = vmatpush3.msra.mxu0 %v258_v21  ;;  %907 = vmatprep.subr.mxu1 %v1142_v0 }
  0x45   :  { %874 = vmatprep.subr.mxu0 %v1142_v0  ;;  %908 = vmatpush3.msra.mxu1 %v258_v21  ;;  %v574_v21 = vld [vmem:[#allocation6 + $0x118] sm:$0xff] }
  0x46   :  { %875 = vmatpush3.msra.mxu0 %v257_v22  ;;  %909 = vmatprep.subr.mxu1 %v1142_v0 }
  0x47   :  { %876 = vmatprep.subr.mxu0 %v1142_v0  ;;  %910 = vmatpush3.msra.mxu1 %v257_v22  ;;  %v573_v22 = vld [vmem:[#allocation6 + $0x110] sm:$0xff] }
  0x48   :  { %877 = vmatpush3.msra.mxu0 %v256_v23  ;;  %911 = vmatprep.subr.mxu1 %v1142_v0 }
  0x49   :  { %878 = vmatprep.subr.mxu0 %v1142_v0  ;;  %244 = vmatprep.mubr.f32.mxu1 %v1142_v0 }
  0x4a   :  { %912 = vmatpush3.msra.mxu1 %v256_v23  ;;  %879 = vmatpush3.msra.mxu0 %v255_v24  ;;  %v572_v23 = vld [vmem:[#allocation6 + $0x108] sm:$0xff] }
  0x4b   :  { %749 = vmatmul.mubr.msk.f32.gmra.mxu1 %vm90_vm0, %v1178_v11  ;;  %913 = vmatprep.subr.mxu1 %v1142_v0  ;;  %v584_v11 = vld [vmem:[#allocation6 + $0x168] sm:$0xff] }
  0x4c   :  { %914 = vmatpush3.msra.mxu1 %v255_v24  ;;  %880 = vmatprep.subr.mxu0 %v1142_v0  ;;  %v571_v24 = vld [vmem:[#allocation6 + $0x100] sm:$0xff] }
  0x4d   :  { %915 = vmatprep.subr.mxu1 %v1142_v0  ;;  %881 = vmatpush3.msra.mxu0 %v254_v25 }
  0x4e   :  { %916 = vmatpush3.msra.mxu1 %v254_v25  ;;  %882 = vmatprep.subr.mxu0 %v1142_v0  ;;  %v80_v25 = vsub.s32 2, %v1223_v28 }
  0x4f   :  { %917 = vmatprep.subr.mxu1 %v1142_v0  ;;  %883 = vmatpush3.msra.mxu0 %v253_v26 }
  0x50   :  { %884 = vmatprep.mubr.msk.f32.mxu0 %vm1143_vm1, %v1142_v0  ;;  %918 = vmatpush3.msra.mxu1 %v253_v26  ;;  %v81_v26 = vrot.slane %v1226_v30, %v80_v25 }
  0x51   :  { %919 = vmatprep.mubr.msk.f32.mxu1 %vm1143_vm1, %v1142_v0  ;;  %922 = vmatprep.subr.mxu0 %v1142_v0 }
  0x52   :  { %957 = vmatprep.subr.mxu1 %v1142_v0 }
  0xed   :  { %v163_v32 = vpop.f32.mrf.mxu0 }
  0xee   :  { %v164_v33 = vadd.f32 %v163_v32, %v73_v31 }
  0xef   :  { %v1229_v34 = vpop.f32.mrf.mxu0 }
  0xf0   :  { %v251_v35 = vmax.f32 %v164_v33, 0.0  ;;  %v1268_v56 = vpop.f32.mrf.mxu1  ;;  %v166_v61 = vadd.f32 %v1229_v34, %v77_v57 }
  0xf1   :  { %v169_v37 = vpop.f32.mrf.mxu0  ;;  %v241_v27 = vadd.f32 %v1268_v56, %v81_v26 }
  0xf2   :  { %v170_v38 = vadd.f32 %v169_v37, %v73_v31  ;;  %885 = vmatmul.mubr.f32.vlgmr.msra.gmra.mxu0 %v251_v35  ;;  %v1271_v58 = vpop.f32.mrf.mxu1 }
  0xf3   :  { %923 = vmatpush3.msra.mxu0 %v427_v36  ;;  %954 = vmatprep.mubr.msk.f32.mxu0 %vm1143_vm1, %v1142_v0  ;;  %v171_v59 = vpop.f32.mrf.mxu0 }
  0xf4   :  { %v252_v40 = vmax.f32 %v170_v38, 0.0  ;;  %924 = vmatprep.subr.mxu0 %v1142_v0  ;;  %v172_v3 = vadd.f32 %v171_v59, %v77_v57 }
  0xf5   :  { %925 = vmatpush3.msra.mxu0 %v426_v39 }
  0xf6   :  { %920 = vmatmul.mubr.f32.vlgmr.msra.gmra.mxu1 %v252_v40  ;;  %926 = vmatprep.subr.mxu0 %v1142_v0 }
  0xf7   :  { %927 = vmatpush3.msra.mxu0 %v425_v41  ;;  %958 = vmatpush3.msra.mxu1 %v427_v36 }
  0xf8   :  { %928 = vmatprep.subr.mxu0 %v1142_v0  ;;  %959 = vmatprep.subr.mxu1 %v1142_v0 }
  0xf9   :  { %929 = vmatpush3.msra.mxu0 %v424_v42  ;;  %960 = vmatpush3.msra.mxu1 %v426_v39 }
  0xfa   :  { %930 = vmatprep.subr.mxu0 %v1142_v0  ;;  %961 = vmatprep.subr.mxu1 %v1142_v0 }
  0xfb   :  { %931 = vmatpush3.msra.mxu0 %v423_v43  ;;  %962 = vmatpush3.msra.mxu1 %v425_v41 }
  0xfc   :  { %932 = vmatprep.subr.mxu0 %v1142_v0  ;;  %963 = vmatprep.subr.mxu1 %v1142_v0 }
  0xfd   :  { %933 = vmatpush3.msra.mxu0 %v422_v44  ;;  %964 = vmatpush3.msra.mxu1 %v424_v42 }
  0xfe   :  { %934 = vmatprep.subr.mxu0 %v1142_v0  ;;  %965 = vmatprep.subr.mxu1 %v1142_v0 }
  0xff   :  { %935 = vmatpush3.msra.mxu0 %v421_v45  ;;  %966 = vmatpush3.msra.mxu1 %v423_v43 }
 0x100   :  { %936 = vmatprep.subr.mxu0 %v1142_v0  ;;  %967 = vmatprep.subr.mxu1 %v1142_v0 }
 0x101   :  { %937 = vmatpush3.msra.mxu0 %v420_v46  ;;  %968 = vmatpush3.msra.mxu1 %v422_v44  ;;  %v65_v44 = vld [vmem:[#allocation4 + $0x41] ss:$0 sm:$0xff] }
 0x102   :  { %938 = vmatprep.subr.mxu0 %v1142_v0  ;;  %969 = vmatprep.subr.mxu1 %v1142_v0 }
 0x103   :  { %939 = vmatpush3.msra.mxu0 %v419_v47  ;;  %970 = vmatpush3.msra.mxu1 %v421_v45 }
 0x104   :  { %940 = vmatprep.subr.mxu0 %v1142_v0  ;;  %971 = vmatprep.subr.mxu1 %v1142_v0 }
 0x105   :  { %941 = vmatpush3.msra.mxu0 %v418_v48  ;;  %972 = vmatpush3.msra.mxu1 %v420_v46 }
 0x106   :  { %942 = vmatprep.subr.mxu0 %v1142_v0  ;;  %973 = vmatprep.subr.mxu1 %v1142_v0 }
 0x107   :  { %943 = vmatpush3.msra.mxu0 %v417_v49  ;;  %974 = vmatpush3.msra.mxu1 %v419_v47 }
 0x108   :  { %944 = vmatprep.subr.mxu0 %v1142_v0  ;;  %975 = vmatprep.subr.mxu1 %v1142_v0 }
 0x109   :  { %945 = vmatpush3.msra.mxu0 %v416_v50  ;;  %976 = vmatpush3.msra.mxu1 %v418_v48 }
 0x10a   :  { %946 = vmatprep.subr.mxu0 %v1142_v0  ;;  %977 = vmatprep.subr.mxu1 %v1142_v0 }
 0x10b   :  { %947 = vmatpush3.msra.mxu0 %v415_v51  ;;  %978 = vmatpush3.msra.mxu1 %v417_v49  ;;  %v1273_v60 = vpop.f32.mrf.mxu1 }
 0x10c   :  { %948 = vmatprep.subr.mxu0 %v1142_v0  ;;  %979 = vmatprep.subr.mxu1 %v1142_v0  ;;  %v247_v33 = vadd.f32 %v1273_v60, %v81_v26 }
 0x10d   :  { %980 = vmatpush3.msra.mxu1 %v416_v50  ;;  %989 = vmatprep.mubr.msk.f32.mxu1 %vm1143_vm1, %v1142_v0  ;;  %v1276_v1 = vpop.f32.mrf.mxu1 }
 0x10e   :  { %981 = vmatprep.subr.mxu1 %v1142_v0  ;;  %949 = vmatpush3.msra.mxu0 %v414_v52 }
 0x10f   :  { %982 = vmatpush3.msra.mxu1 %v415_v51  ;;  %950 = vmatprep.subr.mxu0 %v1142_v0 }
 0x110   :  { %983 = vmatprep.subr.mxu1 %v1142_v0  ;;  %951 = vmatpush3.msra.mxu0 %v413_v53 }
 0x111   :  { %984 = vmatpush3.msra.mxu1 %v414_v52  ;;  %952 = vmatprep.subr.mxu0 %v1142_v0 }
 0x112   :  { %985 = vmatprep.subr.mxu1 %v1142_v0  ;;  %953 = vmatpush3.msra.mxu0 %v412_v54 }
 0x113   :  { %986 = vmatpush3.msra.mxu1 %v413_v53  ;;  %992 = vmatprep.subr.mxu0 %v1142_v0 }
 0x114   :  { %987 = vmatprep.subr.mxu1 %v1142_v0 }
 0x115   :  { %988 = vmatpush3.msra.mxu1 %v412_v54 }
 0x116   :  { %1027 = vmatprep.subr.mxu1 %v1142_v0 }
 0x1b2   :  { %v335_v62 = vpop.f32.mrf.mxu0 }
 0x1b3   :  { %v336_v63 = vadd.f32 %v335_v62, %v166_v61 }
 0x1b4   :  { %v886_v2 = vpop.f32.mrf.mxu0 }
 0x1b5   :  { %v409_v4 = vmax.f32 %v336_v63, 0.0 }
 0x1b6   :  { %v405_v6 = vpop.f32.mrf.mxu1 }
 0x1b7   :  { %v406_v7 = vadd.f32 %v405_v6, %v172_v3  ;;  %955 = vmatmul.mubr.f32.vlgmr.msra.gmra.mxu0 %v409_v4 }
 0x1b8   :  { %v921_v9 = vpop.f32.mrf.mxu1  ;;  %993 = vmatpush3.msra.mxu0 %v586_v5  ;;  %1024 = vmatprep.mubr.msk.f32.mxu0 %vm1143_vm1, %v1142_v0 }
 0x1b9   :  { %v410_v10 = vmax.f32 %v406_v7, 0.0  ;;  %994 = vmatprep.subr.mxu0 %v1142_v0 }
 0x1ba   :  { %995 = vmatpush3.msra.mxu0 %v585_v8 }
 0x1bb   :  { %990 = vmatmul.mubr.f32.vlgmr.msra.gmra.mxu1 %v410_v10  ;;  %996 = vmatprep.subr.mxu0 %v1142_v0 }
 0x1bc   :  { %997 = vmatpush3.msra.mxu0 %v584_v11  ;;  %1028 = vmatpush3.msra.mxu1 %v586_v5 }
 0x1bd   :  { %998 = vmatprep.subr.mxu0 %v1142_v0  ;;  %1029 = vmatprep.subr.mxu1 %v1142_v0 }
 0x1be   :  { %999 = vmatpush3.msra.mxu0 %v583_v12  ;;  %1030 = vmatpush3.msra.mxu1 %v585_v8 }
 0x1bf   :  { %1000 = vmatprep.subr.mxu0 %v1142_v0  ;;  %1031 = vmatprep.subr.mxu1 %v1142_v0 }
 0x1c0   :  { %1001 = vmatpush3.msra.mxu0 %v582_v13  ;;  %1032 = vmatpush3.msra.mxu1 %v584_v11 }
 0x1c1   :  { %1002 = vmatprep.subr.mxu0 %v1142_v0  ;;  %1033 = vmatprep.subr.mxu1 %v1142_v0 }
 0x1c2   :  { %1003 = vmatpush3.msra.mxu0 %v581_v14  ;;  %1034 = vmatpush3.msra.mxu1 %v583_v12 }
 0x1c3   :  { %1004 = vmatprep.subr.mxu0 %v1142_v0  ;;  %1035 = vmatprep.subr.mxu1 %v1142_v0 }
 0x1c4   :  { %1005 = vmatpush3.msra.mxu0 %v580_v15  ;;  %1036 = vmatpush3.msra.mxu1 %v582_v13 }
 0x1c5   :  { %1006 = vmatprep.subr.mxu0 %v1142_v0  ;;  %1037 = vmatprep.subr.mxu1 %v1142_v0 }
 0x1c6   :  { %1007 = vmatpush3.msra.mxu0 %v579_v16  ;;  %1038 = vmatpush3.msra.mxu1 %v581_v14 }
 0x1c7   :  { %1008 = vmatprep.subr.mxu0 %v1142_v0  ;;  %1039 = vmatprep.subr.mxu1 %v1142_v0 }
 0x1c8   :  { %1009 = vmatpush3.msra.mxu0 %v578_v17  ;;  %1040 = vmatpush3.msra.mxu1 %v580_v15 }
 0x1c9   :  { %1010 = vmatprep.subr.mxu0 %v1142_v0  ;;  %1041 = vmatprep.subr.mxu1 %v1142_v0 }
 0x1ca   :  { %1011 = vmatpush3.msra.mxu0 %v577_v18  ;;  %1042 = vmatpush3.msra.mxu1 %v579_v16 }
 0x1cb   :  { %1012 = vmatprep.subr.mxu0 %v1142_v0  ;;  %1043 = vmatprep.subr.mxu1 %v1142_v0 }
 0x1cc   :  { %1013 = vmatpush3.msra.mxu0 %v576_v19  ;;  %1044 = vmatpush3.msra.mxu1 %v578_v17 }
 0x1cd   :  { %1014 = vmatprep.subr.mxu0 %v1142_v0  ;;  %1045 = vmatprep.subr.mxu1 %v1142_v0 }
 0x1ce   :  { %1015 = vmatpush3.msra.mxu0 %v575_v20  ;;  %1046 = vmatpush3.msra.mxu1 %v577_v18 }
 0x1cf   :  { %1016 = vmatprep.subr.mxu0 %v1142_v0  ;;  %1047 = vmatprep.subr.mxu1 %v1142_v0 }
 0x1d0   :  { %1017 = vmatpush3.msra.mxu0 %v574_v21  ;;  %1048 = vmatpush3.msra.mxu1 %v576_v19 }
 0x1d1   :  { %1018 = vmatprep.subr.mxu0 %v1142_v0  ;;  %1049 = vmatprep.subr.mxu1 %v1142_v0 }
 0x1d2   :  { %1050 = vmatpush3.msra.mxu1 %v575_v20  ;;  %1059 = vmatprep.mubr.msk.f32.mxu1 %vm1143_vm1, %v1142_v0 }
 0x1d3   :  { %1051 = vmatprep.subr.mxu1 %v1142_v0  ;;  %1019 = vmatpush3.msra.mxu0 %v573_v22 }
 0x1d4   :  { %1052 = vmatpush3.msra.mxu1 %v574_v21  ;;  %1020 = vmatprep.subr.mxu0 %v1142_v0 }
 0x1d5   :  { %1053 = vmatprep.subr.mxu1 %v1142_v0  ;;  %1021 = vmatpush3.msra.mxu0 %v572_v23 }
 0x1d6   :  { %1054 = vmatpush3.msra.mxu1 %v573_v22  ;;  %1022 = vmatprep.subr.mxu0 %v1142_v0 }
 0x1d7   :  { %1055 = vmatprep.subr.mxu1 %v1142_v0  ;;  %1023 = vmatpush3.msra.mxu0 %v571_v24 }
 0x1d8   :  { %1056 = vmatpush3.msra.mxu1 %v572_v23 }
 0x1d9   :  { %1057 = vmatprep.subr.mxu1 %v1142_v0  ;;  %v84_v0 = vsub.s32 3, %v1223_v28  ;;  %v66_v28 = vld [vmem:[#allocation4 + $0x42] ss:$0 sm:$0xff] }
 0x1da   :  { %1058 = vmatpush3.msra.mxu1 %v571_v24 }
 0x1db   :  { %v85_v39 = vrot.slane %v1226_v30, %v84_v0 }
 0x1dd   :  { %v243_v40 = vadd.f32 %v1271_v58, %v85_v39  ;;  %v249_v45 = vadd.f32 %v1276_v1, %v85_v39 }
 0x277   :  { %v494_v29 = vpop.f32.mrf.mxu0 }
 0x278   :  { %v495_v31 = vadd.f32 %v494_v29, %v241_v27 }
 0x279   :  { %v956_v32 = vpop.f32.mrf.mxu0 }
 0x27a   :  { %v568_v34 = vmax.f32 %v495_v31, 0.0 }
 0x27b   :  { %v564_v35 = vpop.f32.mrf.mxu1 }
 0x27c   :  { %v565_v36 = vadd.f32 %v564_v35, %v247_v33  ;;  %1025 = vmatmul.mubr.f32.vlgmr.msra.gmra.mxu0 %v568_v34 }
 0x27d   :  { %v991_v37 = vpop.f32.mrf.mxu1 }
 0x27e   :  { %v569_v38 = vmax.f32 %v565_v36, 0.0 }
 0x280   :  { %1060 = vmatmul.mubr.f32.vlgmr.msra.gmra.mxu1 %v569_v38 }
 0x33c   :  { %v653_v41 = vpop.f32.mrf.mxu0 }
 0x33d   :  { %v654_v42 = vadd.f32 %v653_v41, %v243_v40 }
 0x33e   :  { %v1026_v43 = vpop.f32.mrf.mxu0 }
 0x33f   :  { %v727_v46 = vmax.f32 %v654_v42, 0.0 }
 0x340   :  { %v723_v47 = vpop.f32.mrf.mxu1 }
 0x341   :  { %v724_v48 = vadd.f32 %v723_v47, %v249_v45  ;;  %v729_v49 = vmul.f32 %v727_v46, %v65_v44 }
 0x342   :  { %v1061_v50 = vpop.f32.mrf.mxu1 }
 0x343   :  { %v728_v51 = vmax.f32 %v724_v48, 0.0  ;;  %730 = vadd.xlane.f32.xlu0 %v729_v49 }
 0x345   :  { %v733_v52 = vmul.f32 %v728_v51, %v65_v44 }
 0x347   :  { %734 = vadd.xlane.f32.xlu0 %v733_v52 }
 0x3cc   :  { %v731_v30 = vpop.xlane.xlu0 %730 }
 0x3cd   :  { %v732_v53 = vadd.f32 %v731_v30, %v66_v28 }
 0x3cf   :  { %738 = vst.msk [vmem:[%s1329_s3] sm:$0xff] %vm737_vm2, %v732_v53 }
 0x3d0   :  { %v735_v54 = vpop.xlane.xlu0 %734 }
 0x3d1   :  { %v736_v55 = vadd.f32 %v735_v54, %v66_v28 }
 0x3d3   :  { %739 = vst.msk [vmem:[%s1329_s3 + $0x8] sm:$0xff] %vm737_vm2, %v736_v55 }
 0x3d4   :  { %744 = vsyncpa [#allocation3], 1 }
 0x3d5   :  { %745 = vsyncpa [#allocation5], 1 }

</bundles_post_ra>
